<compile_context>
chip_gen: v5e
topology: v5e:2x2
jax: 0.10.0
libtpu: 0.0.40
codegen_flags: <defaults>
</compile_context>

<pallas_src>
import jax
import jax.numpy as jnp
from jax.experimental import pallas as pl
from jax.experimental.pallas import tpu as pltpu


def attn_pool_kernel(x_ref, mask_ref, w_ref, o_ref):
    # x_ref:    (TB, S, H)  native input dtype
    # mask_ref: (TB, S)     float32, 1.0 = keep, 0.0 = masked
    # w_ref:    (1, H)      float32
    # o_ref:    (TB, H)     float32
    x = x_ref[...]                                        # native dtype, single read
    mask = mask_ref[...]                                  # (TB, S)
    w = w_ref[...]                                        # (1, H) -> broadcasts as (1,1,H)

    # tanh in f32 on the EUP; logits via VPU multiply + XLU lane-reduce over H.
    # No MXU transpose/relayout of the big activated tile.
    activated = jnp.tanh(x.astype(jnp.float32))           # (TB, S, H) f32
    logits = jnp.sum(activated * w, axis=-1)              # (TB, S) f32, lane reduce

    # Masked softmax over the sequence (lane) axis.
    neg_inf = jnp.float32(-1e30)
    masked_logits = jnp.where(mask > 0, logits, neg_inf)  # (TB, S)
    m = jnp.max(masked_logits, axis=-1, keepdims=True)    # (TB, 1)
    e = jnp.exp(masked_logits - m) * mask                 # (TB, S)
    denom = jnp.sum(e, axis=-1, keepdims=True)            # (TB, 1)
    # tiny eps so an all-masked row yields zeros instead of NaN
    attn = e / (denom + jnp.float32(1e-13))               # (TB, S)

    # Weighted sum over S on the MXU with x in NATIVE dtype (f32 accumulation):
    # (TB,1,S) @ (TB,S,H) -> (TB,1,H).  S is the sublane axis of x, so the big
    # tile is consumed in its natural layout.
    attn3 = attn.astype(x.dtype)[:, None, :]              # (TB, 1, S)
    pooled = jnp.einsum("bls,bsh->blh", attn3, x,
                        preferred_element_type=jnp.float32)   # (TB, 1, H)
    o_ref[...] = pooled[:, 0, :].astype(o_ref.dtype)


def _tpu_vmem_bytes():
    """Per-core VMEM capacity; conservative 64 MiB (v7x-sized) fallback."""
    vmem_cap = 64 << 20
    try:
        info = pltpu.get_tpu_info()
        vmem_cap = int(getattr(info, "vmem_capacity_bytes", vmem_cap))
    except Exception:
        pass
    return vmem_cap


def _pick_tb(B, S, H, itemsize, vmem_cap, multi_tc):
    """Batch rows per grid step, sized from actual per-core VMEM."""
    # Per batch row of a block: 2x double-buffered native-dtype x block,
    # ~2 full f32 intermediates (tanh output + staging), small lane-dense
    # mask/logits/attn/output slabs.
    per_row = S * H * (2 * itemsize + 2 * 4) + S * 5 * 4 + H * 2 * 4
    budget = max((vmem_cap * 3) // 4 - (4 << 20), 8 << 20)
    tb = max(1, min(B, budget // max(1, per_row)))
    if multi_tc and B >= 2:
        # Keep >= 2 grid steps so both TensorCores get work.
        tb = min(tb, max(1, B // 2))
    while B % tb != 0:                            # TB must divide B
        tb -= 1
    return max(tb, 1)


def attn_pool(input_x, x_mask, weight_vector):
    """input_x: (B, S, H); x_mask: (B, S) {0,1}; weight_vector: (H,). Returns (B, H) f32."""
    B, S, H = input_x.shape
    itemsize = jnp.dtype(input_x.dtype).itemsize
    vmem_cap = _tpu_vmem_bytes()
    # <= 64 MiB per-core VMEM => v7x-like two-TensorCore part.
    multi_tc = vmem_cap <= (64 << 20)
    TB = _pick_tb(B, S, H, itemsize, vmem_cap, multi_tc)
    G = B // TB

    # Dense layouts: mask (G, TB, S) f32, weight (1, H) f32, output (G, TB, H) f32.
    mask_in = x_mask.astype(jnp.float32).reshape(G, TB, S)
    w_in = weight_vector.astype(jnp.float32).reshape(1, H)

    # Explicit scoped-VMEM budget: double-buffered blocks + f32 intermediates.
    x_blk = TB * S * H * itemsize
    mask_blk = TB * S * 4
    w_blk = H * 4
    out_blk = TB * H * 4
    interm = 2 * TB * S * H * 4                   # tanh output + one f32 staging copy
    vmem_need = 2 * (x_blk + mask_blk + w_blk + out_blk) + interm + (2 << 20)
    vmem_limit = int(min(max(vmem_need, 24 << 20), (vmem_cap * 3) // 4))

    out = pl.pallas_call(
        attn_pool_kernel,
        out_shape=jax.ShapeDtypeStruct((G, TB, H), jnp.float32),
        grid_spec=pltpu.PrefetchScalarGridSpec(
            num_scalar_prefetch=0,
            grid=(G,),
            in_specs=[
                pl.BlockSpec((TB, S, H), lambda g: (g, 0, 0)),
                pl.BlockSpec((None, TB, S), lambda g: (g, 0, 0)),
                pl.BlockSpec((1, H), lambda g: (0, 0)),
            ],
            out_specs=pl.BlockSpec((None, TB, H), lambda g: (g, 0, 0)),
        ),
        compiler_params=pltpu.CompilerParams(
            dimension_semantics=("parallel",),
            vmem_limit_bytes=vmem_limit,
        ),
    )(input_x, mask_in, w_in)
    return out.reshape(B, H)


def attn_pool_ref(input_x, x_mask, weight_vector):
    """Pure-JAX reference mirroring the PyTorch forward."""
    x = input_x.astype(jnp.float32)
    activated = jnp.tanh(x)
    logits = jnp.einsum("bsh,h->bs", activated, weight_vector.astype(jnp.float32))
    mask = x_mask.astype(jnp.float32)
    masked_logits = jnp.where(mask > 0, logits, -1e30)
    m = jnp.max(masked_logits, axis=1, keepdims=True)
    e = jnp.exp(masked_logits - m) * mask
    attn = e / (jnp.sum(e, axis=1, keepdims=True) + 1e-13)
    return jnp.sum(x * attn[..., None], axis=1)


if __name__ == "__main__":
    B, S, H = 2, 8, 32

    key = jax.random.PRNGKey(0)
    kx, kw = jax.random.split(key)
    input_x = jax.random.normal(kx, (B, S, H), dtype=jnp.float32)
    # Module declares a zero-init (H,) weight and an unused (1,) bias; use random
    # values here so the softmax is non-trivial.
    weight_vector = jax.random.normal(kw, (H,), dtype=jnp.float32) * 0.1

    # Mask: batch 0 fully valid, batch 1 only first 5 positions valid.
    x_mask = jnp.array(
        [[1, 1, 1, 1, 1, 1, 1, 1],
         [1, 1, 1, 1, 1, 0, 0, 0]], dtype=jnp.float32)

    out = attn_pool(input_x, x_mask, weight_vector)
    out = jax.block_until_ready(out)

    ref = attn_pool_ref(input_x, x_mask, weight_vector)
    assert out.shape == (B, H)
    assert jnp.allclose(out, ref, atol=1e-4, rtol=1e-4), (out, ref)

    print("KERNEL_OK")
</pallas_src>

<mosaic_0001>
module attributes {stable_mosaic.version = 11 : i64} {
  func.func @attn_pool_kernel(%arg0: i32, %arg1: memref<1x8x32xf32, #tpu.memory_space<vmem>>, %arg2: memref<1x1x8xf32, #tpu.memory_space<vmem>>, %arg3: memref<1x32xf32, #tpu.memory_space<vmem>>, %arg4: memref<1x1x32xf32, #tpu.memory_space<vmem>>) attributes {dimension_semantics = [#tpu.dimension_semantics<parallel>], iteration_bounds = array<i64: 2>, scalar_prefetch = 0 : i64, scratch_operands = 0 : i64, tpu.core_type = #tpu.core_type<tc>, window_params = [{transform_indices = @transform_0, window_bounds = array<i64: 1, 8, 32>}, {transform_indices = @transform_1, window_bounds = array<i64: 1, 1, 8>}, {pipeline_mode = #tpu.pipeline_mode<synchronous>, transform_indices = @transform_2, window_bounds = array<i64: 1, 32>}, {transform_indices = @transform_3, window_bounds = array<i64: 1, 1, 32>}]} {
    %c0 = arith.constant 0 : index
    %c0_0 = arith.constant 0 : index
    %c0_1 = arith.constant 0 : index
    %0 = vector.load %arg1[%c0, %c0_0, %c0_1] : memref<1x8x32xf32, #tpu.memory_space<vmem>>, vector<1x8x32xf32>
    %c0_2 = arith.constant 0 : index
    %c0_3 = arith.constant 0 : index
    %c0_4 = arith.constant 0 : index
    %1 = vector.load %arg2[%c0_2, %c0_3, %c0_4] : memref<1x1x8xf32, #tpu.memory_space<vmem>>, vector<1x1x8xf32>
    %2 = vector.shape_cast %1 : vector<1x1x8xf32> to vector<1x8xf32>
    %c0_5 = arith.constant 0 : index
    %c0_6 = arith.constant 0 : index
    %3 = vector.load %arg3[%c0_5, %c0_6] : memref<1x32xf32, #tpu.memory_space<vmem>>, vector<1x32xf32>
    %4 = math.tanh %0 : vector<1x8x32xf32>
    %5 = vector.shape_cast %3 : vector<1x32xf32> to vector<1x1x32xf32>
    %6 = vector.broadcast %5 : vector<1x1x32xf32> to vector<1x8x32xf32>
    %7 = arith.mulf %4, %6 : vector<1x8x32xf32>
    %cst = arith.constant dense<0.000000e+00> : vector<1x8xf32>
    %8 = vector.multi_reduction <add>, %7, %cst [2] : vector<1x8x32xf32> to vector<1x8xf32>
    %cst_7 = arith.constant 0.000000e+00 : f32
    %9 = vector.broadcast %cst_7 : f32 to vector<1x8xf32>
    %10 = arith.cmpf ogt, %2, %9 : vector<1x8xf32>
    %cst_8 = arith.constant -1.000000e+30 : f32
    %11 = vector.broadcast %cst_8 : f32 to vector<1x8xf32>
    %12 = arith.select %10, %8, %11 : vector<1x8xi1>, vector<1x8xf32>
    %cst_9 = arith.constant dense<0xFF800000> : vector<1xf32>
    %13 = vector.multi_reduction <maximumf>, %12, %cst_9 [1] : vector<1x8xf32> to vector<1xf32>
    %14 = vector.shape_cast %13 : vector<1xf32> to vector<1x1xf32>
    %15 = vector.broadcast %14 : vector<1x1xf32> to vector<1x8xf32>
    %16 = arith.subf %12, %15 : vector<1x8xf32>
    %17 = math.exp %16 : vector<1x8xf32>
    %18 = arith.mulf %17, %2 : vector<1x8xf32>
    %cst_10 = arith.constant dense<0.000000e+00> : vector<1xf32>
    %19 = vector.multi_reduction <add>, %18, %cst_10 [1] : vector<1x8xf32> to vector<1xf32>
    %20 = vector.shape_cast %19 : vector<1xf32> to vector<1x1xf32>
    %cst_11 = arith.constant 9.99999982E-14 : f32
    %21 = vector.broadcast %cst_11 : f32 to vector<1x1xf32>
    %22 = arith.addf %20, %21 : vector<1x1xf32>
    %23 = vector.broadcast %22 : vector<1x1xf32> to vector<1x8xf32>
    %24 = arith.divf %18, %23 : vector<1x8xf32>
    %25 = vector.shape_cast %24 : vector<1x8xf32> to vector<1x1x8xf32>
    "tpu.trace_start"() <{level = 10 : i32, message = "bls,bsh->blh"}> : () -> ()
    %cst_12 = arith.constant dense<0.000000e+00> : vector<1x1x32xf32>
    %26 = tpu.matmul %25, %0, %cst_12 {dimension_numbers = #tpu.dot_dimension_numbers<[2], [1], [1], [2], [0, 0, 0, 1, 1, 2], [0], [0]>} : vector<1x1x8xf32>, vector<1x8x32xf32>, vector<1x1x32xf32> -> vector<1x1x32xf32>
    "tpu.trace_stop"() : () -> ()
    %27 = vector.shape_cast %26 : vector<1x1x32xf32> to vector<1x32xf32>
    %c0_13 = arith.constant 0 : index
    %c0_14 = arith.constant 0 : index
    %c0_15 = arith.constant 0 : index
    %28 = vector.load %arg4[%c0_13, %c0_14, %c0_15] : memref<1x1x32xf32, #tpu.memory_space<vmem>>, vector<1x1x32xf32>
    %29 = vector.shape_cast %28 : vector<1x1x32xf32> to vector<1x32xf32>
    %30 = vector.shape_cast %27 : vector<1x32xf32> to vector<1x1x32xf32>
    tpu.vector_store %arg4[%c0_13, %c0_14, %c0_15], %30 {strides = array<i32>} : memref<1x1x32xf32, #tpu.memory_space<vmem>>, vector<1x1x32xf32>,
    return
  }
  func.func @transform_0(%arg0: i32) -> (i32, i32, i32) {
    %c0_i32 = arith.constant 0 : i32
    %c0_i32_0 = arith.constant 0 : i32
    %c0_i32_1 = arith.constant 0 : i32
    return %arg0, %c0_i32, %c0_i32_0 : i32, i32, i32
  }
  func.func @transform_1(%arg0: i32) -> (i32, i32, i32) {
    %c0_i32 = arith.constant 0 : i32
    %c0_i32_0 = arith.constant 0 : i32
    %c0_i32_1 = arith.constant 0 : i32
    return %arg0, %c0_i32, %c0_i32_0 : i32, i32, i32
  }
  func.func @transform_2(%arg0: i32) -> (i32, i32) {
    %c0_i32 = arith.constant 0 : i32
    %c0_i32_0 = arith.constant 0 : i32
    %c0_i32_1 = arith.constant 0 : i32
    return %c0_i32, %c0_i32_0 : i32, i32
  }
  func.func @transform_3(%arg0: i32) -> (i32, i32, i32) {
    %c0_i32 = arith.constant 0 : i32
    %c0_i32_0 = arith.constant 0 : i32
    %c0_i32_1 = arith.constant 0 : i32
    return %arg0, %c0_i32, %c0_i32_0 : i32, i32, i32
  }
}

</mosaic_0001>

<bundles_post_ra>
// kernel: tpu_custom_call.1
= control target key start
LH: loop header
LB: loop body
LE: loop exit
PB: predicated region body
PF: predicated region fallthrough
CT: control target
= control target key end

     0   :  { %8 = vsyncpa [#allocation3], 0  ;;  %s811_s0 = inlined_call_operand.hbm [shape: f32[2,8,32], index: 0, kind: input, shape index: {}]   ;;  %s812_s1 = inlined_call_operand.hbm [shape: f32[2,1,8], index: 1, kind: input, shape index: {}]   ;;  %s813_s2 = inlined_call_operand.vmem [shape: f32[1,32], index: 2, kind: input, shape index: {}]   ;;  %s814_s3 = inlined_call_operand.hbm [shape: f32[2,1,32], index: 3, kind: output, shape index: {}]  }
   0x1   :  { %10 = vsyncpa [#allocation3 + $0x1], 0 }
   0x2   :  { %11 = vsyncpa [#allocation6], 0 }
   0x3   :  { %13 = vsyncpa [#allocation6 + $0x1], 0 }
   0x4   :  { %14 = vsyncpa [#allocation4], 0 }
   0x5   :  { %16 = vsyncpa [#allocation4 + $0x1], 0  ;;  %s642_s12 = smov 0   ;;  %s644_s13 = smov 0  }
   0x6   :  { %s646_s14 = smov 0   ;;  %s648_s15 = smov 0  }
   0x7 LB: > { %s663_s16 = sadd.s32 4294967295, %s619_s15   ;;  %s419_s17 = sadd.s32 4294967294, %s619_s15   ;;  %s619_s15 = sphi %s648_s15, %s825_s15   ;;  %s615_s14 = sphi %s646_s14, %s824_s14   ;;  %s611_s13 = sphi %s644_s13, %s823_s13   ;;  %s607_s12 = sphi %s642_s12, %s822_s12  }
   0x8   : > { %s667_s18 = sadd.s32 1, %s619_s15   ;;  %s29_s19 = sadd.s32 1, %s615_s14 }
   0x9   : > { %s26_s20 = ssub.s32 %s619_s15, %s667_s18  ;;  %p36_p0 = scmp.ne.s32.totalorder %s615_s14, %s611_s13 }
   0xa   : > { %p27_p1 = scmp.eq.s32.totalorder %s26_s20, 0  ;;  %p37_p2 = scmp.eq.s32.totalorder %s619_s15, 0 }
   0xb   : > { %p42_p3 = scmp.ne.s32.totalorder %s611_s13, %s607_s12  ;;  %p43_p4 = scmp.eq.s32.totalorder %s663_s16, 0 }
   0xc   : > { %s679_s21 = scalar_select %p27_p1, %s615_s14, %s29_s19  }
   0xd   : > { %p681_p5 = por %p37_p2, %p36_p0  ;;  %p685_p6 = por %p43_p4, %p42_p3 }
   0xe   : > { %p113_p7 = scmp.eq.s32.totalorder %s663_s16, 1  ;;  %p119_p8 = scmp.eq.s32.totalorder %s419_s17, 1 }
   0xf   : > { %p446_p10 = scmp.lt.s32.totalorder %s619_s15, 2  ;;  %s701_s26 = sand.u32 1, %s615_s14  }
  0x10   : > { %p692_p11 = por %p113_p7, %p36_p0  ;;  %p696_p12 = por %p119_p8, %p42_p3 }
  0x11   : > { %s423_s27 = sshll.u32 %s619_s15, 3  ;;  %s422_s28 = sshll.u32 %s701_s26, 3 }
  0x12   : > { %s150_s4 = scalar_lea.hbm %s811_s0, %s423_s27  ;;  %s146_s6 = scalar_lea.vmem [#allocation2], %s422_s28 }
  0x13   : > { %s152_s5 = sshll.u32 %s150_s4, 4  ;;  %s154_s7 = sshll.u32 %s146_s6, 4  ;;  %s153_s5 = int_to_ptr.hbm [resolvable:$true] %s152_s5  ;;  %s155_s7 = int_to_ptr.vmem [resolvable:$true] %s154_s7 }
  0x14   : > { %p710_p13 = pnand %p446_p10, %p681_p5  ;;  %p424_p0 = scmp.ge.s32.totalorder %s619_s15, 1 }
  0x15   : > { %p176_p1 = scmp.lt.s32.totalorder %s619_s15, 3  ;;  %s143_s9 = scalar_lea.sflag [#allocation3], %s701_s26 }
  0x16   : > { %s489_s10 = sshra.s32 %s153_s5, 4  ;;  %p493_p3 = pneg %p710_p13  ;;  %s490_s10 = int_to_ptr.hbm [resolvable:$true] %s489_s10 }
  0x17   : > { %s491_s11 = scalar_lea.hbm %s490_s10, 8  ;;  %s496_s20 = scalar_lea.hbm %s811_s0, 16 }
  0x18   : > { %p492_p2 = scmp.ne.s32.totalorder %s490_s10, %s491_s11  ;;  %p497_p5 = scmp.lt.s32.totalorder %s490_s10, %s811_s0 }
  0x19   : > { %p498_p8 = scmp.lt.s32.totalorder %s496_s20, %s491_s11 }
  0x1a   : > { %p494_p4 = pnand %p493_p3, %p492_p2 }
  0x1b   : > { %p499_p10 = por %p498_p8, %p497_p5 }
  0x1c   : > { %p495_p7 = pneg %p494_p4 }
  0x1e   : > { %p500_p9 = pnand %p499_p10, %p495_p7 }
  0x20   : > { %503 = shalt.err (!%p500_p9)
}
  0x21   : > { %438 = dma.hbm_to_vmem [thread:$0]  (!%p710_p13), %s153_s5, 128, %s155_s7, %s143_s9  }
  0x22   : > { %p734_p2 = pnand %p424_p0, %p176_p1  ;;  %s167_s4 = scalar_lea.hbm %s812_s1, %s619_s15 }
  0x23   : > { %s169_s6 = sshll.u32 %s167_s4, 4  ;;  %s164_s10 = scalar_lea.vmem [#allocation5], %s701_s26  ;;  %s170_s6 = int_to_ptr.hbm [resolvable:$true] %s169_s6 }
  0x24   : > { %s171_s11 = sshll.u32 %s164_s10, 4  ;;  %s162_s17 = scalar_lea.sflag [#allocation6], %s701_s26  ;;  %s172_s11 = int_to_ptr.vmem [resolvable:$true] %s171_s11 }
  0x25   : > { %s519_s19 = sshra.s32 %s170_s6, 4  ;;  %s526_s9 = scalar_lea.hbm %s812_s1, 2  ;;  %s520_s19 = int_to_ptr.hbm [resolvable:$true] %s519_s19 }
  0x26   : > { %s521_s20 = scalar_lea.hbm %s520_s19, 1  ;;  %p527_p4 = scmp.lt.s32.totalorder %s520_s19, %s812_s1 }
  0x27   : > { %p522_p9 = scmp.ne.s32.totalorder %s520_s19, %s521_s20  ;;  %p528_p7 = scmp.lt.s32.totalorder %s526_s9, %s521_s20 }
  0x29   : > { %p524_p0 = pnand %p522_p9, %p493_p3  ;;  %p529_p5 = por %p528_p7, %p527_p4 }
  0x2b   : > { %p525_p1 = pneg %p524_p0 }
  0x2d   : > { %p530_p8 = pnand %p529_p5, %p525_p1 }
  0x2f   : > { %533 = shalt.err (!%p530_p8)
}
  0x30   : > { %441 = dma.hbm_to_vmem [thread:$0]  (!%p710_p13), %s170_s6, 16, %s172_s11, %s162_s17  }
  0x31   : > { %180 = sbr.rel (%p734_p2) target bundleno = 716 (0x2cc), region = 32  ;;  %s758_s26 = sand.u32 (!%p734_p2), 1, %s611_s13  }
  0x32   : > { %s425_s29 = sshll.u32 (!%p734_p2), %s758_s26, 3  ;;  %s183_s30 = scalar_lea.sflag (!%p734_p2), [#allocation3], %s758_s26 }
  0x33   : > { %s186_s4 = scalar_lea.vmem (!%p734_p2), [#allocation2], %s425_s29 }
  0x36   : > { %594 = dma.done.wait (%p685_p6), %s183_s30, 128  }
  0x37   : > { %596 = vsyncadd (%p685_p6), %s183_s30, 4294967168  ;;  %s193_s8 = scalar_lea.sflag [#allocation6], %s758_s26  ;;  %s195_s28 = scalar_lea.vmem [#allocation5], %s758_s26 }
  0x38   : > { %598 = dma.done.wait (%p685_p6), %s193_s8, 16  }
  0x39   : > { %600 = vsyncadd (%p685_p6), %s193_s8, 4294967280  ;;  %v222_v0 = vld [vmem:[%s186_s4] sm:$0xff]  ;;  %v482_v1 = vld [vmem:[%s813_s2] ss:$0 sm:$0xff]  ;;  %vm230_vm0 = vcmask 261120   ;;  %v621_v5 = vmov 0   ;;  %v263_v16 = vlaneseq  ;;  %s330_s17 = scalar_lea.hbm %s814_s3, %s663_s16 }
  0x3a   : > { %483 = vtanh.f32 %v222_v0  ;;  %314 = vmatpush.msra.mxu0 %v222_v0  ;;  %481 = vset.pattern.permute.xlu0 %v621_v5  ;;  %v223_v18 = vld [vmem:[%s195_s28] sm:$0x1]  ;;  %vm268_vm2 = vcmask 57344   ;;  %vm295_vm7 = vcmask 64512   ;;  %s221_s19 = scalar_lea.vmem [#allocation7], %s758_s26  ;;  %s334_s5 = sshll.u32 %s330_s17, 4  ;;  %s335_s5 = int_to_ptr.hbm [resolvable:$true] %s334_s5 }
  0x3b   : > { %v264_v17 = vand.u32 127, %v263_v16  ;;  %vm234_vm1 = vcmp.gt.f32.partialorder %v223_v18, 0.0  ;;  %s332_s20 = sshll.u32 %s221_s19, 4  ;;  %vm319_vm8 = vcmask 253952   ;;  %s322_s7 = scalar_lea.sflag [#allocation4], %s758_s26  ;;  %s333_s20 = int_to_ptr.vmem [resolvable:$true] %s332_s20 }
  0x3c   : > { %s563_s9 = sshra.s32 %s335_s5, 4  ;;  %s569_s16 = scalar_lea.hbm %s814_s3, 2  ;;  %s564_s9 = int_to_ptr.hbm [resolvable:$true] %s563_s9 }
  0x3d   : > { %s565_s22 = scalar_lea.hbm %s564_s9, 1  ;;  %p570_p10 = scmp.lt.s32.totalorder %s564_s9, %s814_s3 }
  0x3e   : > { %p566_p6 = scmp.ne.s32.totalorder %s564_s9, %s565_s22  ;;  %p571_p2 = scmp.lt.s32.totalorder %s569_s16, %s565_s22 }
  0x40   : > { %v484_v2 = vpop.eup %483  ;;  %p567_p13 = pnand %p566_p6, %p692_p11  ;;  %p572_p9 = por %p571_p2, %p570_p10 }
  0x41   : > { %v229_v3 = vmul.f32 %v484_v2, %v482_v1 }
  0x42   : > { %p568_p3 = pneg %p567_p13 }
  0x43   : > { %v231_v4 = vsel %vm230_vm0, %v229_v3, 0.0 }
  0x44   : > { %232 = vadd.xlane.f32.xlu0 %v231_v4  ;;  %p573_p0 = pnand %p572_p9, %p568_p3 }
  0xb7   : > { %v233_v6 = vpop.xlane.xlu0 %232 }
  0xb8   : > { %v236_v7 = vperm.slane %v233_v6, 0  ;;  %v237_v8 = vperm.slane %v233_v6, 1  ;;  %v238_v9 = vperm.slane %v233_v6, 2  ;;  %v239_v10 = vperm.slane %v233_v6, 3 }
  0xb9   : > { %v240_v11 = vperm.slane %v233_v6, 4  ;;  %v241_v12 = vperm.slane %v233_v6, 5  ;;  %v242_v13 = vperm.slane %v233_v6, 6  ;;  %v243_v14 = vperm.slane %v233_v6, 7 }
  0xba   : > { %244 = vst [vmem:[#allocation1] ss:$9 sm:$0xff] %v236_v7 }
  0xbb   : > { %246 = vst [vmem:[#allocation1 + $0x1] ss:$9 sm:$0xff] %v237_v8 }
  0xbc   : > { %248 = vst [vmem:[#allocation1 + $0x2] ss:$9 sm:$0xff] %v238_v9 }
  0xbd   : > { %250 = vst [vmem:[#allocation1 + $0x3] ss:$9 sm:$0xff] %v239_v10 }
  0xbe   : > { %252 = vst [vmem:[#allocation1 + $0x4] ss:$9 sm:$0xff] %v240_v11 }
  0xbf   : > { %254 = vst [vmem:[#allocation1 + $0x5] ss:$9 sm:$0xff] %v241_v12 }
  0xc0   : > { %256 = vst [vmem:[#allocation1 + $0x6] ss:$9 sm:$0xff] %v242_v13 }
  0xc1   : > { %258 = vst [vmem:[#allocation1 + $0x7] ss:$9 sm:$0xff] %v243_v14 }
  0xc8   : > { %v259_v15 = vld [vmem:[#allocation1] sm:$0xff] }
  0xc9   : > { %261 = vperm.xlu0 %481, %v259_v15  }
 0x13b   : > { %v262_v19 = vpop.permute.xlu0 %261 }
 0x13c   : > { %v265_v20 = vperm.slane %v262_v19, %v264_v17 }
 0x13e   : > { %v267_v21 = vsel %vm234_vm1, %v265_v20, -1e+30 }
 0x13f   : > { %v269_v22 = vsel %vm268_vm2, %v267_v21, -inf }
 0x140   : > { %270 = vmax.xlane.f32.xlu1 %v269_v22 }
 0x1b3   : > { %v271_v23 = vpop.xlane.xlu1 %270 }
 0x1b4   : > { %v272_v24 = vsub.f32 %v267_v21, %v271_v23 }
 0x1b6   : > { %v273_v25 = vmul.f32 1.442695, %v272_v24 }
 0x1b8   : > { %485 = vpow2.f32 %v273_v25 }
 0x1be   : > { %v486_v26 = vpop.eup %485 }
 0x1bf   : > { %v275_v27 = vmul.f32 %v486_v26, %v223_v18 }
 0x1c1   : > { %v276_v28 = vsel %vm268_vm2, %v275_v27, 0.0 }
 0x1c2   : > { %277 = vadd.xlane.f32.xlu1 %v276_v28 }
 0x235   : > { %v278_v29 = vpop.xlane.xlu1 %277 }
 0x236   : > { %v279_v30 = vadd.f32 1e-13, %v278_v29 }
 0x238   : > { %487 = vrcp.f32 %v279_v30  ;;  %v291_v34 = vand.u32 2147483648, %v279_v30  ;;  %v289_v36 = vand.u32 2147483647, %v279_v30  ;;  %vm285_vm4 = vweird.f32 %v279_v30 }
 0x23a   : > { %v292_v38 = vor.u32 1.1754944e-38, %v291_v34  ;;  %vm290_vm6 = vcmp.eq.f32.partialorder %v289_v36, 8.507059e+37 }
 0x23e   : > { %v488_v31 = vpop.eup %487 }
 0x23f   : > { %v281_v32 = vmul.f32 %v488_v31, %v279_v30  ;;  %vm286_vm3 = vweird.f32 %v488_v31 }
 0x240   : > { %vm287_vm5 = vmor %vm285_vm4, %vm286_vm3 }
 0x241   : > { %v282_v33 = vsub.f32 1.0, %v281_v32 }
 0x243   : > { %v283_v35 = vmul.f32 %v488_v31, %v282_v33 }
 0x245   : > { %v284_v37 = vadd.f32 %v488_v31, %v283_v35 }
 0x247   : > { %v288_v39 = vsel %vm287_vm5, %v488_v31, %v284_v37 }
 0x248   : > { %v293_v40 = vsel %vm290_vm6, %v292_v38, %v288_v39 }
 0x249   : > { %v294_v41 = vmul.f32 %v293_v40, %v275_v27 }
 0x24b   : > { %426 = vmatmul.msk.f32.vlgmr.msra.gmra.mxu0 %vm295_vm7, %v294_v41 }
 0x2c8   : > { %v316_v42 = vpop.f32.mrf.mxu0 }
 0x2c9   : > { %320 = vst.msk [vmem:[%s221_s19] sm:$0x1] %vm319_vm8, %v316_v42 }
 0x2ca   : > { %576 = shalt.err (!%p573_p0)
}
 0x2cb   : > { %433 = dma.vmem_to_hbm [thread:$0]  (%p692_p11), %s333_s20, 16, %s335_s5, %s322_s7  }
 0x2cc PF: > { %s346_s26 = sand.u32 1, %s607_s12   ;;  %p821_p1 = scmp.ge.s32.totalorder %s619_s15, 2 }
 0x2cd   : > { %s347_s8 = scalar_lea.sflag [#allocation4], %s346_s26 }
 0x2ce   : > { %p443_p4 = pnand %p821_p1, %p696_p12 }
 0x2d0   : > { %p444_p7 = pneg %p443_p4 }
 0x2d2   : > { %602 = dma.done.wait (%p444_p7), %s347_s8, 16  }
 0x2d3   : > { %604 = vsyncadd (%p444_p7), %s347_s8, 4294967280  ;;  %p19_p5 = scmp.ge.s32.totalorder %s667_s18, 4   ;;  %s822_s12 = smov %s611_s13 }
 0x2d4   : > { %s823_s13 = smov %s615_s14  ;;  %s824_s14 = smov %s679_s21 }
 0x2d5   : > { %s825_s15 = smov %s667_s18  ;;  %21 = sbr.rel (!%p19_p5) target bundleno = 7 (0x7), region = 97 }
 0x2da   :  { %352 = vsyncpa [#allocation3], 1 }
 0x2db   :  { %354 = vsyncpa [#allocation3 + $0x1], 1 }
 0x2dc   :  { %355 = vsyncpa [#allocation6], 1 }
 0x2dd   :  { %357 = vsyncpa [#allocation6 + $0x1], 1 }
 0x2de   :  { %358 = vsyncpa [#allocation4], 1 }
 0x2df   :  { %360 = vsyncpa [#allocation4 + $0x1], 1 }

</bundles_post_ra>
